<compile_context>
chip_gen: v6e
topology: v6e:2x2x1
jax: 0.10.0
libtpu: 0.0.40
codegen_flags: <defaults>
</compile_context>

<pallas_src>
import functools

import jax
import jax.numpy as jnp
from jax.experimental import pallas as pl
from jax.experimental.pallas import tpu as pltpu


def _detector_kernel(
    threshold,
    alpha_fast,
    alpha_slow,
    is_first,
    # inputs (VMEM blocks, f32[TILE_R, 128])
    val_ref,
    mu_fast_ref,
    mu_slow_ref,
    count_ref,
    # outputs (aliased onto the mu_fast / mu_slow / count inputs)
    mu_fast_out,
    mu_slow_out,
    count_out,
):
    val = val_ref[...]
    mu_fast_prev = mu_fast_ref[...]

    thr = jnp.float32(threshold)

    # Previous-step bounds, recomputed from the stored mu_fast (invariant:
    # T_upper/T_lower = mu_fast +/- threshold*|mu_fast|, including zero init).
    abs_prev = jnp.abs(mu_fast_prev)
    t_upper = mu_fast_prev + thr * abs_prev
    t_lower = mu_fast_prev - thr * abs_prev

    # forward(): on the first observation mu_fast/mu_slow are reset to val
    # BEFORE the bounds check, but the bounds come from the OLD mu_fast
    # (matches PyTorch ordering).  is_first is a Python bool -> specialized
    # kernel, no per-element select.
    if is_first:
        mu_fast = val
        mu_slow = val
    else:
        mu_fast = mu_fast_prev
        mu_slow = mu_slow_ref[...]

    # _update_state()
    in_bounds = ((mu_slow > t_lower) & (mu_slow < t_upper)) | (mu_fast == 0.0)
    new_count = jnp.where(in_bounds, count_ref[...] + 1.0, 0.0)

    # _update_estimates()
    mu_fast_out[...] = mu_fast + jnp.float32(alpha_fast) * (val - mu_fast)
    mu_slow_out[...] = mu_slow + jnp.float32(alpha_slow) * (val - mu_slow)
    count_out[...] = new_count


def _slab_geometry(n, max_tile=2048, split_rows=256):
    """Return (rows, tile_r) for a lane-dense (rows, 128) slab.

    rows is a multiple of 8 and of tile_r.  tile_r <= max_tile (fits v5e's
    16 MiB scoped-VMEM default with 7 double-buffered blocks).  Slabs with
    rows >= split_rows get at least 2 grid blocks so v7x's two TensorCores
    both participate; tiny slabs stay single-block (step overhead dominates).
    """
    cols = 128
    rows = max(1, -(-n // cols))          # ceil(n / 128)
    rows = max(8, -(-rows // 8) * 8)      # round up to sublane multiple
    if rows < split_rows:
        return rows, rows
    n_blocks = max(2, -(-rows // max_tile))
    tile_r = -(-rows // n_blocks)
    tile_r = -(-tile_r // 8) * 8          # multiple of 8, still <= max_tile
    return n_blocks * tile_r, tile_r


class ConvergenceDetector:
    """JAX/Pallas port of the PyTorch ConvergenceDetector.

    State is held persistently in slab layout; `mu_fast`, `mu_slow`,
    `convergence_count`, `T_upper`, `T_lower`, `converged` are lazy views in
    the original shape.
    """

    def __init__(self, shape, tau_fast=10, tau_slow=100, threshold=0.1, patience=100):
        self.shape = tuple(int(d) for d in shape)
        self.threshold = float(threshold)
        self.patience = int(patience)
        self._alpha_fast = 1.0 / float(tau_fast)
        self._alpha_slow = 1.0 / float(tau_slow)

        # Kept for API parity with the PyTorch buffers (scalar-filled).
        self.tau_fast = jnp.full(self.shape, float(tau_fast), jnp.float32)
        self.tau_slow = jnp.full(self.shape, float(tau_slow), jnp.float32)
        self.val = jnp.zeros(self.shape, jnp.float32)

        n = 1
        for d in self.shape:
            n *= d
        self._n = n
        self._cols = 128
        self._rows, self._tile_r = _slab_geometry(n)

        # Persistent slab-layout state (distinct buffers so donation works).
        self._mu_fast_slab = jnp.zeros((self._rows, self._cols), jnp.float32)
        self._mu_slow_slab = jnp.zeros((self._rows, self._cols), jnp.float32)
        self._count_slab = jnp.zeros((self._rows, self._cols), jnp.float32)

        self._step = self._build_step(is_first=False)
        self._step_first = self._build_step(is_first=True)

    # ---- pallas_call + jit construction ---------------------------------------------
    def _build_call(self, is_first):
        kernel = functools.partial(
            _detector_kernel,
            self.threshold,
            self._alpha_fast,
            self._alpha_slow,
            is_first,
        )
        rows, cols, tile_r = self._rows, self._cols, self._tile_r
        slab = jax.ShapeDtypeStruct((rows, cols), jnp.float32)
        blk = pl.BlockSpec((tile_r, cols), lambda i: (i, 0))
        n_elem = rows * cols
        return pl.pallas_call(
            kernel,
            out_shape=(slab, slab, slab),
            grid=(rows // tile_r,),
            in_specs=[blk, blk, blk, blk],        # val, mu_fast, mu_slow, count
            out_specs=(blk, blk, blk),            # mu_fast, mu_slow, count
            # in-place state update: mu_fast->out0, mu_slow->out1, count->out2
            input_output_aliases={1: 0, 2: 1, 3: 2},
            compiler_params=pltpu.CompilerParams(
                dimension_semantics=("parallel",),
            ),
            cost_estimate=pl.CostEstimate(
                flops=12 * n_elem,
                transcendentals=0,
                bytes_accessed=7 * n_elem * 4,    # 4 inputs + 3 outputs, f32
            ),
        )

    def _build_step(self, is_first):
        """One whole detector step as a single jitted executable.

        The val cast/pad/reshape fuses with the pallas_call dispatch, and
        donate_argnums on the three state slabs backs input_output_aliases
        with real buffer donation (true in-place state update).
        """
        p_call = self._build_call(is_first)
        rows, cols, n = self._rows, self._cols, self._n
        pad = rows * cols - n

        def step(val, mu_fast_slab, mu_slow_slab, count_slab):
            flat = jnp.asarray(val, jnp.float32).reshape(-1)
            if pad:
                flat = jnp.pad(flat, (0, pad))
            val_slab = flat.reshape(rows, cols)
            return p_call(val_slab, mu_fast_slab, mu_slow_slab, count_slab)

        return jax.jit(step, donate_argnums=(1, 2, 3))

    # ---- slab helpers -----------------------------------------------------------------
    def _from_slab(self, s):
        return s.reshape(-1)[: self._n].reshape(self.shape)

    # ---- lazy views in the original shape ----------------------------------------------
    @property
    def mu_fast(self):
        return self._from_slab(self._mu_fast_slab)

    @property
    def mu_slow(self):
        return self._from_slab(self._mu_slow_slab)

    @property
    def convergence_count(self):
        return self._from_slab(self._count_slab)

    @property
    def T_upper(self):
        mf = self._from_slab(self._mu_fast_slab)
        return mf + self.threshold * jnp.abs(mf)

    @property
    def T_lower(self):
        mf = self._from_slab(self._mu_fast_slab)
        return mf - self.threshold * jnp.abs(mf)

    @property
    def converged(self):
        return self._from_slab(self._count_slab) >= self.patience

    # ---- public API ---------------------------------------------------------------------
    def reset_counters(self):
        self._count_slab = jnp.zeros_like(self._count_slab)

    def forward(self, val, first_val=False):
        val = jnp.asarray(val)
        self.val = val.astype(jnp.float32)
        step = self._step_first if first_val else self._step
        mu_f, mu_s, cnt = step(
            val, self._mu_fast_slab, self._mu_slow_slab, self._count_slab
        )
        # Old slabs were donated; rebind immediately.
        self._mu_fast_slab = mu_f
        self._mu_slow_slab = mu_s
        self._count_slab = cnt
        return self.converged


# ---- pure-JAX reference (mirrors the PyTorch forward, keeps explicit T state) ----------
def _reference_step(state, val, first_val, threshold, patience):
    mu_fast = jnp.where(first_val, val, state["mu_fast"])
    mu_slow = jnp.where(first_val, val, state["mu_slow"])
    in_bounds = ((mu_slow > state["T_lower"]) & (mu_slow < state["T_upper"])) | (mu_fast == 0.0)
    cnt = jnp.where(in_bounds, state["count"] + 1.0, 0.0)
    converged = cnt >= patience
    mu_fast = mu_fast + (1.0 / state["tau_fast"]) * (val - mu_fast)
    mu_slow = mu_slow + (1.0 / state["tau_slow"]) * (val - mu_slow)
    t_up = mu_fast + threshold * jnp.abs(mu_fast)
    t_lo = mu_fast - threshold * jnp.abs(mu_fast)
    return dict(state, mu_fast=mu_fast, mu_slow=mu_slow, T_upper=t_up,
                T_lower=t_lo, count=cnt), converged


def _run_check(shape, n_steps, patience, seed):
    det = ConvergenceDetector(shape, tau_fast=10, tau_slow=100,
                              threshold=0.1, patience=patience)
    key = jax.random.PRNGKey(seed)
    ref_state = {
        "mu_fast": jnp.zeros(shape, jnp.float32),
        "mu_slow": jnp.zeros(shape, jnp.float32),
        "T_upper": jnp.zeros(shape, jnp.float32),
        "T_lower": jnp.zeros(shape, jnp.float32),
        "count": jnp.zeros(shape, jnp.float32),
        "tau_fast": jnp.full(shape, 10.0, jnp.float32),
        "tau_slow": jnp.full(shape, 100.0, jnp.float32),
    }
    ref_conv = jnp.zeros(shape, jnp.bool_)
    for step in range(n_steps):
        key, sub = jax.random.split(key)
        # nearly-constant signal -> should converge
        val = 1.0 + 0.001 * jax.random.normal(sub, shape, jnp.float32)
        conv = det.forward(val, first_val=(step == 0))
        jax.block_until_ready(conv)
        ref_state, ref_conv = _reference_step(ref_state, val, step == 0, 0.1, patience)

    assert jnp.allclose(det.mu_fast, ref_state["mu_fast"], atol=1e-6)
    assert jnp.allclose(det.mu_slow, ref_state["mu_slow"], atol=1e-6)
    assert jnp.allclose(det.T_upper, ref_state["T_upper"], atol=1e-6)
    assert jnp.allclose(det.T_lower, ref_state["T_lower"], atol=1e-6)
    assert jnp.array_equal(det.convergence_count, ref_state["count"])
    assert jnp.array_equal(det.converged, ref_conv)
    return det.converged


if __name__ == "__main__":
    # Small primary shape (single-block grid, no padding).
    conv_small = _run_check((2, 4, 16, 16), n_steps=6, patience=3, seed=0)
    # Larger shape: exercises the >=2-block row grid, ragged-tail padding,
    # and the donated in-place state update.
    conv_big = _run_check((3, 5, 70, 70), n_steps=4, patience=2, seed=0)

    jax.block_until_ready((conv_small, conv_big))
    print("KERNEL_OK")
</pallas_src>

<mosaic_0001>
module attributes {stable_mosaic.version = 11 : i64} {
  func.func @_detector_kernel(%arg0: i32, %arg1: memref<16x128xf32, #tpu.memory_space<vmem>>, %arg2: memref<16x128xf32, #tpu.memory_space<vmem>>, %arg3: memref<16x128xf32, #tpu.memory_space<vmem>>, %arg4: memref<16x128xf32, #tpu.memory_space<vmem>>, %arg5: memref<16x128xf32, #tpu.memory_space<vmem>>, %arg6: memref<16x128xf32, #tpu.memory_space<vmem>>, %arg7: memref<16x128xf32, #tpu.memory_space<vmem>>) attributes {dimension_semantics = [#tpu.dimension_semantics<parallel>], iteration_bounds = array<i64: 1>, scalar_prefetch = 0 : i64, scratch_operands = 0 : i64, tpu.core_type = #tpu.core_type<tc>, window_params = [{transform_indices = @transform_0, window_bounds = array<i64: 16, 128>}, {transform_indices = @transform_1, window_bounds = array<i64: 16, 128>}, {transform_indices = @transform_2, window_bounds = array<i64: 16, 128>}, {transform_indices = @transform_3, window_bounds = array<i64: 16, 128>}, {transform_indices = @transform_4, window_bounds = array<i64: 16, 128>}, {transform_indices = @transform_5, window_bounds = array<i64: 16, 128>}, {transform_indices = @transform_6, window_bounds = array<i64: 16, 128>}]} {
    %c0 = arith.constant 0 : index
    %c0_0 = arith.constant 0 : index
    %0 = vector.load %arg1[%c0, %c0_0] : memref<16x128xf32, #tpu.memory_space<vmem>>, vector<16x128xf32>
    %c0_1 = arith.constant 0 : index
    %c0_2 = arith.constant 0 : index
    %1 = vector.load %arg2[%c0_1, %c0_2] : memref<16x128xf32, #tpu.memory_space<vmem>>, vector<16x128xf32>
    %2 = math.absf %1 : vector<16x128xf32>
    %cst = arith.constant 1.000000e-01 : f32
    %3 = vector.broadcast %cst : f32 to vector<16x128xf32>
    %4 = arith.mulf %3, %2 : vector<16x128xf32>
    %5 = arith.addf %1, %4 : vector<16x128xf32>
    %cst_3 = arith.constant 1.000000e-01 : f32
    %6 = vector.broadcast %cst_3 : f32 to vector<16x128xf32>
    %7 = arith.mulf %6, %2 : vector<16x128xf32>
    %8 = arith.subf %1, %7 : vector<16x128xf32>
    %9 = arith.cmpf ogt, %0, %8 : vector<16x128xf32>
    %10 = arith.cmpf olt, %0, %5 : vector<16x128xf32>
    %11 = arith.andi %9, %10 : vector<16x128xi1>
    %cst_4 = arith.constant 0.000000e+00 : f32
    %12 = vector.broadcast %cst_4 : f32 to vector<16x128xf32>
    %13 = arith.cmpf oeq, %0, %12 : vector<16x128xf32>
    %14 = arith.ori %11, %13 : vector<16x128xi1>
    %c0_5 = arith.constant 0 : index
    %c0_6 = arith.constant 0 : index
    %15 = vector.load %arg4[%c0_5, %c0_6] : memref<16x128xf32, #tpu.memory_space<vmem>>, vector<16x128xf32>
    %cst_7 = arith.constant 1.000000e+00 : f32
    %16 = vector.broadcast %cst_7 : f32 to vector<16x128xf32>
    %17 = arith.addf %15, %16 : vector<16x128xf32>
    %cst_8 = arith.constant 0.000000e+00 : f32
    %18 = vector.broadcast %cst_8 : f32 to vector<16x128xf32>
    %19 = arith.select %14, %17, %18 : vector<16x128xi1>, vector<16x128xf32>
    %20 = arith.subf %0, %0 : vector<16x128xf32>
    %cst_9 = arith.constant 1.000000e-01 : f32
    %21 = vector.broadcast %cst_9 : f32 to vector<16x128xf32>
    %22 = arith.mulf %21, %20 : vector<16x128xf32>
    %23 = arith.addf %0, %22 : vector<16x128xf32>
    %c0_10 = arith.constant 0 : index
    %c0_11 = arith.constant 0 : index
    %24 = vector.load %arg5[%c0_10, %c0_11] : memref<16x128xf32, #tpu.memory_space<vmem>>, vector<16x128xf32>
    tpu.vector_store %arg5[%c0_10, %c0_11], %23 {strides = array<i32>} : memref<16x128xf32, #tpu.memory_space<vmem>>, vector<16x128xf32>,
    %25 = arith.subf %0, %0 : vector<16x128xf32>
    %cst_12 = arith.constant 0.00999999977 : f32
    %26 = vector.broadcast %cst_12 : f32 to vector<16x128xf32>
    %27 = arith.mulf %26, %25 : vector<16x128xf32>
    %28 = arith.addf %0, %27 : vector<16x128xf32>
    %c0_13 = arith.constant 0 : index
    %c0_14 = arith.constant 0 : index
    %29 = vector.load %arg6[%c0_13, %c0_14] : memref<16x128xf32, #tpu.memory_space<vmem>>, vector<16x128xf32>
    tpu.vector_store %arg6[%c0_13, %c0_14], %28 {strides = array<i32>} : memref<16x128xf32, #tpu.memory_space<vmem>>, vector<16x128xf32>,
    %c0_15 = arith.constant 0 : index
    %c0_16 = arith.constant 0 : index
    %30 = vector.load %arg7[%c0_15, %c0_16] : memref<16x128xf32, #tpu.memory_space<vmem>>, vector<16x128xf32>
    tpu.vector_store %arg7[%c0_15, %c0_16], %19 {strides = array<i32>} : memref<16x128xf32, #tpu.memory_space<vmem>>, vector<16x128xf32>,
    return
  }
  func.func @transform_0(%arg0: i32) -> (i32, i32) {
    %c0_i32 = arith.constant 0 : i32
    %c0_i32_0 = arith.constant 0 : i32
    return %arg0, %c0_i32 : i32, i32
  }
  func.func @transform_1(%arg0: i32) -> (i32, i32) {
    %c0_i32 = arith.constant 0 : i32
    %c0_i32_0 = arith.constant 0 : i32
    return %arg0, %c0_i32 : i32, i32
  }
  func.func @transform_2(%arg0: i32) -> (i32, i32) {
    %c0_i32 = arith.constant 0 : i32
    %c0_i32_0 = arith.constant 0 : i32
    return %arg0, %c0_i32 : i32, i32
  }
  func.func @transform_3(%arg0: i32) -> (i32, i32) {
    %c0_i32 = arith.constant 0 : i32
    %c0_i32_0 = arith.constant 0 : i32
    return %arg0, %c0_i32 : i32, i32
  }
  func.func @transform_4(%arg0: i32) -> (i32, i32) {
    %c0_i32 = arith.constant 0 : i32
    %c0_i32_0 = arith.constant 0 : i32
    return %arg0, %c0_i32 : i32, i32
  }
  func.func @transform_5(%arg0: i32) -> (i32, i32) {
    %c0_i32 = arith.constant 0 : i32
    %c0_i32_0 = arith.constant 0 : i32
    return %arg0, %c0_i32 : i32, i32
  }
  func.func @transform_6(%arg0: i32) -> (i32, i32) {
    %c0_i32 = arith.constant 0 : i32
    %c0_i32_0 = arith.constant 0 : i32
    return %arg0, %c0_i32 : i32, i32
  }
}

</mosaic_0001>

<bundles_post_ra>
// kernel: step.1
= control target key start
LH: loop header
LB: loop body
LE: loop exit
PB: predicated region body
PF: predicated region fallthrough
CT: control target
= control target key end

     0   :  { %12 = vsyncpa [#allocation3], 0  ;;  %s403_s0 = inlined_call_operand.vmem [shape: f32[16,128], index: 0, kind: input, shape index: {}]   ;;  %s404_s1 = inlined_call_operand.hbm [shape: f32[16,128], index: 1, kind: input, shape index: {}, may-alias: {1,4}]   ;;  %s405_s2 = inlined_call_operand.hbm [shape: f32[16,128], index: 2, kind: input, shape index: {}, may-alias: {2,5}]   ;;  %s406_s3 = inlined_call_operand.hbm [shape: f32[16,128], index: 3, kind: input, shape index: {}, may-alias: {3,6}]   ;;  %s407_s4 = inlined_call_operand.hbm [shape: f32[16,128], index: 4, kind: output, shape index: {0}, may-alias: {1,4}]   ;;  %s408_s5 = inlined_call_operand.hbm [shape: f32[16,128], index: 5, kind: output, shape index: {1}, may-alias: {2,5}]   ;;  %s409_s6 = inlined_call_operand.hbm [shape: f32[16,128], index: 6, kind: output, shape index: {2}, may-alias: {3,6}]  }
   0x1   :  { %13 = vsyncpa [#allocation6], 0 }
   0x2   :  { %14 = vsyncpa [#allocation4], 0 }
   0x3   :  { %15 = vsyncpa [#allocation10], 0  ;;  %s292_s21 = smov [#allocation5]   ;;  %s293_s23 = smov [#allocation2]  }
   0x4   :  { %s35_s22 = sshll.u32 %s292_s21, 4  ;;  %s23_s24 = sshll.u32 %s293_s23, 4  ;;  %s36_s22 = int_to_ptr.vmem [resolvable:$true] %s35_s22  ;;  %s24_s24 = int_to_ptr.vmem [resolvable:$true] %s23_s24 }
   0x5   :  { %s172_s25 = scalar_lea.vmem %s36_s22, 256  ;;  %p177_p1 = scmp.lt.s32.totalorder %s36_s22, %s36_s22 }
   0x6   :  { %p173_p0 = scmp.ne.s32.totalorder %s36_s22, %s172_s25  ;;  %p178_p2 = scmp.lt.s32.totalorder %s172_s25, %s172_s25 }
   0x8   :  { %p179_p3 = por %p178_p2, %p177_p1 }
   0xa   :  { %p180_p4 = pnand %p179_p3, %p173_p0 }
   0xc   :  { %183 = shalt.err (!%p180_p4)
}
   0xd   :  { %s294_s26 = smov 128   ;;  %s295_s27 = smov 8  }
   0xe   :  { %41 = dma.hbm_to_vmem [thread:$0]  %s405_s2, 256, %s36_s22, [#allocation6], %s294_s26, %s294_s26, %s295_s27  }
   0xf   :  { %s192_s30 = scalar_lea.vmem %s24_s24, 256  ;;  %p197_p6 = scmp.lt.s32.totalorder %s24_s24, %s24_s24 }
  0x10   :  { %p193_p5 = scmp.ne.s32.totalorder %s24_s24, %s192_s30  ;;  %p198_p7 = scmp.lt.s32.totalorder %s192_s30, %s192_s30 }
  0x12   :  { %p199_p8 = por %p198_p7, %p197_p6 }
  0x14   :  { %p200_p9 = pnand %p199_p8, %p193_p5 }
  0x16   :  { %203 = shalt.err (!%p200_p9)
}
  0x17   :  { %29 = dma.hbm_to_vmem [thread:$0]  %s404_s1, 256, %s24_s24, [#allocation3], %s294_s26, %s294_s26, %s295_s27  }
  0x18   :  { %s296_s9 = smov [#allocation7]  }
  0x19   :  { %s47_s10 = sshll.u32 %s296_s9, 4  ;;  %s48_s10 = int_to_ptr.vmem [resolvable:$true] %s47_s10 }
  0x1a   :  { %s212_s11 = scalar_lea.vmem %s48_s10, 256  ;;  %p217_p11 = scmp.lt.s32.totalorder %s48_s10, %s48_s10 }
  0x1b   :  { %p213_p10 = scmp.ne.s32.totalorder %s48_s10, %s212_s11  ;;  %p218_p12 = scmp.lt.s32.totalorder %s212_s11, %s212_s11 }
  0x1d   :  { %p219_p13 = por %p218_p12, %p217_p11 }
  0x1f   :  { %p220_p0 = pnand %p219_p13, %p213_p10 }
  0x21   :  { %223 = shalt.err (!%p220_p0)
}
  0x22   :  { %53 = dma.hbm_to_vmem [thread:$0]  %s406_s3, 256, %s48_s10, [#allocation6], %s294_s26, %s294_s26, %s295_s27  }
  0x23   :  { %284 = dma.done.wait [#allocation3], 256  }
  0x24   :  { %285 = vsyncadd [#allocation3], 4294967040 }
  0x25   :  { %286 = dma.done.wait [#allocation6], 512  }
  0x26   :  { %287 = vsyncadd [#allocation6], 4294966784  ;;  %v63_v0 = vld [vmem:[%s403_s0] sm:$0xff]  ;;  %v359_v1 = vld [vmem:[%s403_s0 + $0x8] sm:$0xff]  ;;  %s297_s3 = smov [#allocation9]   ;;  %s298_s17 = smov [#allocation8]  }
  0x27   :  { %v65_v2 = vld [vmem:[#allocation2] sm:$0xff]  ;;  %v91_v3 = vsub.f32 %v63_v0, %v63_v0  ;;  %v92_v4 = vsub.f32 %v359_v1, %v359_v1  ;;  %v66_v6 = vld [vmem:[#allocation2 + $0x8] sm:$0xff]  ;;  %s124_s16 = sshll.u32 %s297_s3, 4  ;;  %s112_s18 = sshll.u32 %s298_s17, 4  ;;  %vm81_vm0 = vcmp.eq.f32.partialorder %v63_v0, 0.0  ;;  %s364_s16 = int_to_ptr.vmem [resolvable:$true] %s124_s16  ;;  %s367_s18 = int_to_ptr.vmem [resolvable:$true] %s112_s18 }
  0x28   :  { %v67_v5 = vand.u32 2147483647, %v65_v2  ;;  %v85_v7 = vld [vmem:[#allocation7] sm:$0xff]  ;;  %v68_v8 = vand.u32 2147483647, %v66_v6  ;;  %v86_v22 = vld [vmem:[#allocation7 + $0x8] sm:$0xff]  ;;  %p229_p2 = scmp.lt.s32.totalorder %s364_s16, %s364_s16 }
  0x29   :  { %v99_v9 = vmul.f32 0.01, %v91_v3  ;;  %v100_v10 = vmul.f32 0.01, %v92_v4  ;;  %v93_v11 = vmul.f32 0.1, %v91_v3 }
  0x2a   :  { %v94_v12 = vmul.f32 0.1, %v92_v4  ;;  %v69_v13 = vmul.f32 0.1, %v67_v5  ;;  %v70_v14 = vmul.f32 0.1, %v68_v8 }
  0x2b   :  { %v101_v15 = vadd.f32 %v99_v9, %v63_v0  ;;  %v102_v16 = vadd.f32 %v100_v10, %v359_v1  ;;  %v95_v17 = vadd.f32 %v93_v11, %v63_v0  ;;  %v87_v23 = vadd.f32 1.0, %v85_v7  ;;  %s299_s0 = smov [#allocation11]   ;;  %s224_s20 = scalar_lea.vmem %s364_s16, 256 }
  0x2c   :  { %v96_v18 = vadd.f32 %v94_v12, %v359_v1  ;;  %v71_v19 = vadd.f32 %v69_v13, %v65_v2  ;;  %v73_v20 = vsub.f32 %v65_v2, %v69_v13  ;;  %v72_v21 = vadd.f32 %v70_v14, %v66_v6  ;;  %s136_s19 = sshll.u32 %s299_s0, 4  ;;  %p225_p1 = scmp.ne.s32.totalorder %s364_s16, %s224_s20  ;;  %s137_s19 = int_to_ptr.vmem [resolvable:$true] %s136_s19 }
  0x2d   :  { %103 = vst [vmem:[#allocation9] sm:$0xff] %v101_v15  ;;  %104 = vst [vmem:[#allocation9 + $0x8] sm:$0xff] %v102_v16  ;;  %v74_v24 = vsub.f32 %v66_v6, %v70_v14  ;;  %p230_p3 = scmp.lt.s32.totalorder %s224_s20, %s224_s20 }
  0x2e   :  { %97 = vst [vmem:[#allocation8] sm:$0xff] %v95_v17  ;;  %98 = vst [vmem:[#allocation8 + $0x8] sm:$0xff] %v96_v18  ;;  %vm75_vm1 = vcmp.gt.f32.partialorder %v63_v0, %v73_v20  ;;  %vm77_vm2 = vcmp.lt.f32.partialorder %v63_v0, %v71_v19  ;;  %vm78_vm3 = vcmp.lt.f32.partialorder %v359_v1, %v72_v21 }
  0x2f   :  { %p231_p4 = por %p230_p3, %p229_p2 }
  0x31   :  { %p232_p5 = pnand %p231_p4, %p225_p1 }
  0x33   :  { %235 = shalt.err (!%p232_p5)
}
  0x34   :  { %130 = dma.vmem_to_hbm [thread:$0]  %s364_s16, 256, %s408_s5, [#allocation10], %s294_s26, %s294_s26, %s295_s27   ;;  %vm79_vm4 = vmand %vm75_vm1, %vm77_vm2  ;;  %vm76_vm5 = vcmp.gt.f32.partialorder %v359_v1, %v74_v24  ;;  %vm82_vm6 = vcmp.eq.f32.partialorder %v359_v1, 0.0  ;;  %v88_v25 = vadd.f32 1.0, %v86_v22 }
  0x35   :  { %s244_s23 = scalar_lea.vmem %s367_s18, 256  ;;  %p249_p7 = scmp.lt.s32.totalorder %s367_s18, %s367_s18 }
  0x36   :  { %p245_p6 = scmp.ne.s32.totalorder %s367_s18, %s244_s23  ;;  %p250_p8 = scmp.lt.s32.totalorder %s244_s23, %s244_s23 }
  0x38   :  { %p251_p9 = por %p250_p8, %p249_p7 }
  0x3a   :  { %p252_p10 = pnand %p251_p9, %p245_p6 }
  0x3c   :  { %255 = shalt.err (!%p252_p10)
}
  0x3d   :  { %118 = dma.vmem_to_hbm [thread:$0]  %s367_s18, 256, %s407_s4, [#allocation4], %s294_s26, %s294_s26, %s295_s27   ;;  %vm83_vm7 = vmor %vm79_vm4, %vm81_vm0 }
  0x3e   :  { %v89_v26 = vsel %vm83_vm7, %v87_v23, 0.0  ;;  %vm80_vm8 = vmand %vm76_vm5, %vm78_vm3  ;;  %s264_s5 = scalar_lea.vmem %s137_s19, 256  ;;  %p269_p12 = scmp.lt.s32.totalorder %s137_s19, %s137_s19 }
  0x3f   :  { %105 = vst [vmem:[#allocation11] sm:$0xff] %v89_v26  ;;  %vm84_vm9 = vmor %vm80_vm8, %vm82_vm6  ;;  %p265_p11 = scmp.ne.s32.totalorder %s137_s19, %s264_s5  ;;  %p270_p13 = scmp.lt.s32.totalorder %s264_s5, %s264_s5 }
  0x40   :  { %v90_v27 = vsel %vm84_vm9, %v88_v25, 0.0 }
  0x41   :  { %106 = vst [vmem:[#allocation11 + $0x8] sm:$0xff] %v90_v27  ;;  %p271_p0 = por %p270_p13, %p269_p12 }
  0x43   :  { %p272_p1 = pnand %p271_p0, %p265_p11 }
  0x45   :  { %275 = shalt.err (!%p272_p1)
}
  0x46   :  { %142 = dma.vmem_to_hbm [thread:$0]  %s137_s19, 256, %s409_s6, [#allocation10], %s294_s26, %s294_s26, %s295_s27  }
  0x47   :  { %288 = dma.done.wait [#allocation4], 256  }
  0x48   :  { %289 = vsyncadd [#allocation4], 4294967040 }
  0x49   :  { %290 = dma.done.wait [#allocation10], 512  }
  0x4a   :  { %291 = vsyncadd [#allocation10], 4294966784 }
  0x4b   :  { %152 = vsyncpa [#allocation3], 1 }
  0x4c   :  { %153 = vsyncpa [#allocation6], 1 }
  0x4d   :  { %154 = vsyncpa [#allocation4], 1 }
  0x4e   :  { %155 = vsyncpa [#allocation10], 1 }

</bundles_post_ra>
